<compile_context>
chip_gen: v7x
topology: tpu7x:2x2x1
jax: 0.10.0
libtpu: 0.0.40
codegen_flags: <defaults>
</compile_context>

<pallas_src>
import functools

import numpy as np
import jax
import jax.numpy as jnp
from jax import lax
from jax.experimental import pallas as pl
from jax.experimental.pallas import tpu as pltpu


# ---------------------------------------------------------------------------
# Kernel: per-class statistics, tiled over (batch sample, 128-lane row blocks).
# ---------------------------------------------------------------------------
def _recall_ce_stats_kernel(x_ref, t_ref, gt_out, ce_out, ms_out,
                            gt_acc, ce_acc, ms_acc, *, n_valid, needs_mask):
    # x_ref : (1, C, RT, 128)  logits (native dtype; cast per-slab after load)
    # t_ref : (1, RT, 128)     int32 targets
    # gt_out/ce_out : (1, C, 128) f32 lane-dense per-sample partials
    # ms_out : (1, 1, 128) f32
    # gt_acc/ce_acc : (C, 128) f32 scratch ; ms_acc : (1, 128) f32 scratch
    l = pl.program_id(1)

    @pl.when(l == 0)
    def _init():
        gt_acc[...] = jnp.zeros_like(gt_acc)
        ce_acc[...] = jnp.zeros_like(ce_acc)
        ms_acc[...] = jnp.zeros_like(ms_acc)

    _, C, RT, LW = x_ref.shape
    t = t_ref[0]                                               # (RT, LW) int32

    # Validity of each position: masks the padded lane tail and the out-of-bounds rows
    # of a partial last tile.  Fused straight into the predicates below (never by
    # multiplication, so NaN/Inf garbage in OOB lanes cannot leak); dropped entirely
    # when the tiling is exact.
    if needs_mask:
        row = lax.broadcasted_iota(jnp.int32, (RT, LW), 0)
        if n_valid % LW == 0:
            valid = (l * RT + row) < (n_valid // LW)
        else:
            lane = lax.broadcasted_iota(jnp.int32, (RT, LW), 1)
            valid = ((l * RT + row) * LW + lane) < n_valid
        gate = lambda p: jnp.logical_and(p, valid)
    else:
        gate = lambda p: p

    # Pass A: channel max + first-max argmax, unrolled over the C slabs.  Pure VPU
    # (compare / select / max); no cross-sublane or cross-lane reductions in the loop.
    m = x_ref[0, 0].astype(jnp.float32)                        # (RT, LW)
    pred = jnp.zeros((RT, LW), jnp.int32)
    for c in range(1, C):
        xc = x_ref[0, c].astype(jnp.float32)
        is_new = xc > m                                        # strict > keeps first-max index
        pred = jnp.where(is_new, c, pred)
        m = jnp.maximum(xc, m)

    # Pass B: sum of exp (stable logsumexp) + per-class pixel counts / x[target] sums.
    sumexp = jnp.zeros((RT, LW), jnp.float32)
    cnt_rows, xt_rows = [], []
    for c in range(C):
        xc = x_ref[0, c].astype(jnp.float32)
        sumexp = sumexp + jnp.exp(xc - m)
        hit = gate(t == c)
        cnt_rows.append(jnp.sum(jnp.where(hit, 1.0, 0.0), axis=0, keepdims=True))
        xt_rows.append(jnp.sum(jnp.where(hit, xc, 0.0), axis=0, keepdims=True))
    lse = m + jnp.log(sumexp)                                  # (RT, LW)

    miss = gate(pred != t)
    ms_acc[...] += jnp.sum(jnp.where(miss, 1.0, 0.0), axis=0, keepdims=True)

    # Pass C: per-class sums of logsumexp; ce_sum[c] = sum(lse | t==c) - sum(x_c | t==c).
    lse_rows = []
    for c in range(C):
        hit = gate(t == c)
        lse_rows.append(jnp.sum(jnp.where(hit, lse, 0.0), axis=0, keepdims=True))

    gt_acc[...] += jnp.concatenate(cnt_rows, axis=0)           # (C, 128)
    ce_acc[...] += (jnp.concatenate(lse_rows, axis=0)
                    - jnp.concatenate(xt_rows, axis=0))

    # Finalize: dump the lane-wide accumulators once per batch sample (lane-dense
    # stores); the tiny O(C*128) cross-lane reduce happens in the wrapper epilogue.
    @pl.when(l == pl.num_programs(1) - 1)
    def _finalize():
        gt_out[0] = gt_acc[...]
        ce_out[0] = ce_acc[...]
        ms_out[0] = ms_acc[...]


# ---------------------------------------------------------------------------
# Wrapper-side helpers.
# ---------------------------------------------------------------------------
def _choose_rows_tile(n_ch, n_rows, x_itemsize, max_rows_tile=None):
    """Rows-of-128-lanes tile, sized per TPU generation from physical VMEM."""
    try:
        info = pltpu.get_tpu_info()
        vmem_cap = int(getattr(info, "vmem_capacity_bytes", 64 * 1024 * 1024))
    except Exception:                      # conservative fallback = v7x (smallest VMEM)
        vmem_cap = 64 * 1024 * 1024
    # Scoped-VMEM ceiling: ~48 MiB on v7x (64 MiB physical), 96 MiB on v5e/v6e (128 MiB).
    vmem_limit = int(min((vmem_cap * 3) // 4, 96 * 1024 * 1024))
    # Per 128-lane row: double-buffered x + target input blocks plus ~10 f32 (RT,128)
    # temporaries (m / pred / sumexp / lse / in-flight selects) that live in VMEM.
    per_row = 2 * (n_ch * 128 * x_itemsize + 128 * 4) + 10 * 128 * 4
    budget = vmem_limit - 6 * 1024 * 1024
    rt = int(min(max(budget // per_row, 8), 1024))
    if max_rows_tile is not None:
        rt = max(8, min(rt, int(max_rows_tile)))
    if rt >= n_rows:
        return int(n_rows), vmem_limit                 # single full-extent tile per sample
    gran = 16 if rt >= 16 else 8                        # (8,128) rule; 16 keeps bf16 packing happy
    rt = (rt // gran) * gran
    return int(rt), vmem_limit


def _torch_unique_counter(dense_counts, n_classes, ignore_index):
    """Vectorized, deterministic replica of the module's
         idx, cnt = torch.unique(data, return_counts=True)
         cnt[idx == ignore_index] = cnt.clone()[0]
         idx[idx == ignore_index] = 1
         counter = torch.ones(n_classes); counter[idx] = cnt.float()
       given per-class counts of `data` (values assumed in [0, n_classes)).
       Writes follow ascending class order with last-write-wins; the only possible
       collision is at destination index 1 (from the redirected ignore_index)."""
    counts = dense_counts.astype(jnp.float32)
    present = counts > 0
    first_cnt = counts[jnp.argmax(present)]            # count of the smallest present class
    cls = jnp.arange(n_classes)
    counter = jnp.where(jnp.logical_and(present, cls != ignore_index), counts, 1.0)
    if n_classes > 1:
        if ignore_index == 1:
            v1 = jnp.where(present[1], first_cnt, 1.0)
        elif ignore_index < 1:        # ignore's redirected write lands first, class 1 overwrites
            v1 = jnp.where(present[1], counts[1],
                           jnp.where(present[ignore_index], first_cnt, 1.0))
        else:                         # class 1 writes first, ignore's redirect overwrites
            v1 = jnp.where(present[ignore_index], first_cnt,
                           jnp.where(present[1], counts[1], 1.0))
        counter = counter.at[1].set(v1)
    return counter


# ---------------------------------------------------------------------------
# Public entry point: RecallCrossEntropy forward.
# ---------------------------------------------------------------------------
def recall_cross_entropy(x, target, *, ignore_index=0, max_rows_tile=None):
    """x: (N, C, *spatial) float logits, target: (N, *spatial) int class ids in [0, C)."""
    N, C = x.shape[:2]
    n_classes = C
    L = int(np.prod(x.shape[2:]))
    M = float(N * L)

    # Keep logits in their native dtype (f32 / bf16); cast per-slab inside the kernel.
    if x.dtype == jnp.float32 or x.dtype == jnp.bfloat16:
        xk = x
    else:
        xk = x.astype(jnp.float32)
    tk = target.astype(jnp.int32)

    # Fold the flattened spatial axis into (rows, 128) lanes.  Free reshape when
    # L % 128 == 0 (common case); otherwise one small pad to the next lane multiple
    # (the padded tail is masked in-kernel and contributes nothing).
    if L % 128 == 0:
        R = L // 128
        x4 = xk.reshape(N, C, R, 128)
        t3 = tk.reshape(N, R, 128)
    else:
        R = (L + 127) // 128
        pad = R * 128 - L
        x4 = jnp.pad(xk.reshape(N, C, L), ((0, 0), (0, 0), (0, pad))).reshape(N, C, R, 128)
        t3 = jnp.pad(tk.reshape(N, L), ((0, 0), (0, pad))).reshape(N, R, 128)

    rt, vmem_limit = _choose_rows_tile(C, R, x4.dtype.itemsize, max_rows_tile)
    n_tiles = (R + rt - 1) // rt
    needs_mask = (L % 128 != 0) or (R % rt != 0)

    kernel = functools.partial(_recall_ce_stats_kernel, n_valid=L, needs_mask=needs_mask)

    cost = pl.CostEstimate(
        flops=int(N * L * (20 * C + 12)),
        transcendentals=int(N * L * (C + 1)),
        bytes_accessed=int(N * C * L * x4.dtype.itemsize + N * L * 4
                           + N * (2 * C + 1) * 128 * 4),
    )

    gt_p, ce_p, ms_p = pl.pallas_call(
        kernel,
        out_shape=(
            jax.ShapeDtypeStruct((N, C, 128), jnp.float32),
            jax.ShapeDtypeStruct((N, C, 128), jnp.float32),
            jax.ShapeDtypeStruct((N, 1, 128), jnp.float32),
        ),
        grid_spec=pltpu.PrefetchScalarGridSpec(
            num_scalar_prefetch=0,
            grid=(N, n_tiles),
            in_specs=[
                pl.BlockSpec((1, C, rt, 128), lambda n, l: (n, 0, l, 0)),
                pl.BlockSpec((1, rt, 128), lambda n, l: (n, l, 0)),
            ],
            out_specs=[
                pl.BlockSpec((1, C, 128), lambda n, l: (n, 0, 0)),
                pl.BlockSpec((1, C, 128), lambda n, l: (n, 0, 0)),
                pl.BlockSpec((1, 1, 128), lambda n, l: (n, 0, 0)),
            ],
            scratch_shapes=[
                pltpu.VMEM((C, 128), jnp.float32),
                pltpu.VMEM((C, 128), jnp.float32),
                pltpu.VMEM((1, 128), jnp.float32),
            ],
        ),
        compiler_params=pltpu.CompilerParams(
            dimension_semantics=("parallel", "arbitrary"),
            vmem_limit_bytes=vmem_limit,
        ),
        cost_estimate=cost,
    )(x4, t3)

    gt_counts = jnp.sum(gt_p, axis=(0, 2))       # (C,)  pixels per class in target
    ce_sums = jnp.sum(ce_p, axis=(0, 2))         # (C,)  sum of CE over pixels of class c
    K = jnp.sum(ms_p)                            # scalar: #pixels with argmax != target

    # fn = target.view(-1)[idex.long()]  -- integer (0/1) indexing, reproduced exactly:
    # fn holds (M - K) copies of target_flat[0] and K copies of target_flat[1].
    t_flat = target.reshape(-1)
    i1 = 1 if t_flat.shape[0] > 1 else 0
    t0 = t_flat[0].astype(jnp.int32)
    t1 = t_flat[i1].astype(jnp.int32)
    fn_counts = (jnp.zeros((n_classes,), jnp.float32)
                 .at[t0].add(M - K)
                 .at[t1].add(K))

    gt_counter = _torch_unique_counter(gt_counts, n_classes, ignore_index)
    fn_counter = _torch_unique_counter(fn_counts, n_classes, ignore_index)
    weight = fn_counter / gt_counter

    # F.cross_entropy(..., ignore_index) zeros CE at ignored pixels; those all live in
    # ce_sums[ignore_index], so zero that entry before the weighted combine.
    cls = jnp.arange(n_classes)
    ce_eff = jnp.where(cls == ignore_index, 0.0, ce_sums)
    return jnp.sum(weight * ce_eff) / M


# ---------------------------------------------------------------------------
# Pure-JAX reference mirroring the PyTorch forward (for verification).
# ---------------------------------------------------------------------------
def _recall_ce_ref(x, target, n_classes, ignore_index):
    N, C = x.shape[:2]
    L = int(np.prod(x.shape[2:]))
    logits = x.reshape(N, C, L).astype(jnp.float32)
    tgt = target.reshape(N, L).astype(jnp.int32)

    pred = jnp.argmax(logits, axis=1)                       # (N, L)
    idex = (pred != tgt).reshape(-1)
    t_flat = tgt.reshape(-1)
    fn = t_flat[idex.astype(jnp.int32)]                     # integer 0/1 indexing, as in torch code

    gt_dense = jnp.zeros((n_classes,), jnp.float32).at[t_flat].add(1.0)
    fn_dense = jnp.zeros((n_classes,), jnp.float32).at[fn].add(1.0)
    gt_counter = _torch_unique_counter(gt_dense, n_classes, ignore_index)
    fn_counter = _torch_unique_counter(fn_dense, n_classes, ignore_index)
    weight = fn_counter / gt_counter

    m = jnp.max(logits, axis=1, keepdims=True)
    lse = m[:, 0, :] + jnp.log(jnp.sum(jnp.exp(logits - m), axis=1))
    x_t = jnp.take_along_axis(logits, tgt[:, None, :], axis=1)[:, 0, :]
    ce = lse - x_t
    ce = jnp.where(tgt == ignore_index, 0.0, ce)            # ignore_index pixels -> 0
    loss = weight[tgt] * ce
    return jnp.mean(loss)


if __name__ == "__main__":
    key = jax.random.PRNGKey(0)
    kx, kt = jax.random.split(key)

    N, C, H, W = 2, 4, 16, 16
    x = jax.random.normal(kx, (N, C, H, W), dtype=jnp.float32)
    target = jax.random.randint(kt, (N, H, W), 0, C, dtype=jnp.int32)

    loss = recall_cross_entropy(x, target, ignore_index=0)
    jax.block_until_ready(loss)
    ref = _recall_ce_ref(x, target, n_classes=C, ignore_index=0)
    np.testing.assert_allclose(np.asarray(loss), np.asarray(ref), rtol=1e-5, atol=1e-5)

    # Exercise the multi-tile path: L % 128 != 0 (lane-granular mask) and a partially
    # out-of-bounds last row-tile, with a forced small rows-tile.
    kx2, kt2 = jax.random.split(jax.random.PRNGKey(1))
    N2, C2, H2, W2 = 2, 4, 40, 40                     # L = 1600 -> 13 rows of 128 lanes
    x2 = jax.random.normal(kx2, (N2, C2, H2, W2), dtype=jnp.float32)
    t2 = jax.random.randint(kt2, (N2, H2, W2), 0, C2, dtype=jnp.int32)
    loss2 = recall_cross_entropy(x2, t2, ignore_index=0, max_rows_tile=8)
    jax.block_until_ready(loss2)
    ref2 = _recall_ce_ref(x2, t2, n_classes=C2, ignore_index=0)
    np.testing.assert_allclose(np.asarray(loss2), np.asarray(ref2), rtol=1e-5, atol=1e-5)

    print("KERNEL_OK")
</pallas_src>

<mosaic_0001>
module attributes {stable_mosaic.version = 11 : i64} {
  func.func @_recall_ce_stats_kernel(%arg0: i32, %arg1: i32, %arg2: memref<1x4x2x128xf32, #tpu.memory_space<vmem>>, %arg3: memref<1x2x128xi32, #tpu.memory_space<vmem>>, %arg4: memref<1x4x128xf32, #tpu.memory_space<vmem>>, %arg5: memref<1x4x128xf32, #tpu.memory_space<vmem>>, %arg6: memref<1x1x128xf32, #tpu.memory_space<vmem>>, %arg7: memref<4x128xf32, #tpu.memory_space<vmem>>, %arg8: memref<4x128xf32, #tpu.memory_space<vmem>>, %arg9: memref<1x128xf32, #tpu.memory_space<vmem>>) attributes {dimension_semantics = [#tpu.dimension_semantics<parallel>, #tpu.dimension_semantics<arbitrary>], iteration_bounds = array<i64: 2, 1>, scalar_prefetch = 0 : i64, scratch_operands = 3 : i64, tpu.core_type = #tpu.core_type<tc>, window_params = [{transform_indices = @transform_0, window_bounds = array<i64: 1, 4, 2, 128>}, {transform_indices = @transform_1, window_bounds = array<i64: 1, 2, 128>}, {transform_indices = @transform_2, window_bounds = array<i64: 1, 4, 128>}, {transform_indices = @transform_3, window_bounds = array<i64: 1, 4, 128>}, {transform_indices = @transform_4, window_bounds = array<i64: 1, 1, 128>}]} {
    %c0_i32 = arith.constant 0 : i32
    %0 = arith.cmpi eq, %arg1, %c0_i32 : i32
    %1 = arith.extui %0 : i1 to i32
    %c0_i32_0 = arith.constant 0 : i32
    %2 = arith.cmpi ne, %1, %c0_i32_0 : i32
    scf.if %2 {
      %cst_86 = arith.constant 0.000000e+00 : f32
      %139 = vector.broadcast %cst_86 : f32 to vector<4x128xf32>
      %c0_87 = arith.constant 0 : index
      %c0_88 = arith.constant 0 : index
      %140 = vector.load %arg7[%c0_87, %c0_88] : memref<4x128xf32, #tpu.memory_space<vmem>>, vector<4x128xf32>
      tpu.vector_store %arg7[%c0_87, %c0_88], %139 {strides = array<i32>} : memref<4x128xf32, #tpu.memory_space<vmem>>, vector<4x128xf32>,
      %cst_89 = arith.constant 0.000000e+00 : f32
      %141 = vector.broadcast %cst_89 : f32 to vector<4x128xf32>
      %c0_90 = arith.constant 0 : index
      %c0_91 = arith.constant 0 : index
      %142 = vector.load %arg8[%c0_90, %c0_91] : memref<4x128xf32, #tpu.memory_space<vmem>>, vector<4x128xf32>
      tpu.vector_store %arg8[%c0_90, %c0_91], %141 {strides = array<i32>} : memref<4x128xf32, #tpu.memory_space<vmem>>, vector<4x128xf32>,
      %cst_92 = arith.constant 0.000000e+00 : f32
      %143 = vector.broadcast %cst_92 : f32 to vector<1x128xf32>
      %c0_93 = arith.constant 0 : index
      %c0_94 = arith.constant 0 : index
      %144 = vector.load %arg9[%c0_93, %c0_94] : memref<1x128xf32, #tpu.memory_space<vmem>>, vector<1x128xf32>
      tpu.vector_store %arg9[%c0_93, %c0_94], %143 {strides = array<i32>} : memref<1x128xf32, #tpu.memory_space<vmem>>, vector<1x128xf32>,
    } else {
    }
    %c0 = arith.constant 0 : index
    %c0_1 = arith.constant 0 : index
    %c0_2 = arith.constant 0 : index
    %3 = vector.load %arg3[%c0, %c0_1, %c0_2] : memref<1x2x128xi32, #tpu.memory_space<vmem>>, vector<1x2x128xi32>
    %4 = vector.shape_cast %3 : vector<1x2x128xi32> to vector<2x128xi32>
    %c0_3 = arith.constant 0 : index
    %c0_4 = arith.constant 0 : index
    %c0_5 = arith.constant 0 : index
    %c0_6 = arith.constant 0 : index
    %5 = vector.load %arg2[%c0_3, %c0_4, %c0_5, %c0_6] : memref<1x4x2x128xf32, #tpu.memory_space<vmem>>, vector<1x1x2x128xf32>
    %6 = vector.shape_cast %5 : vector<1x1x2x128xf32> to vector<2x128xf32>
    %c0_i32_7 = arith.constant 0 : i32
    %7 = vector.broadcast %c0_i32_7 : i32 to vector<2x128xi32>
    %c0_8 = arith.constant 0 : index
    %c1 = arith.constant 1 : index
    %c0_9 = arith.constant 0 : index
    %c0_10 = arith.constant 0 : index
    %8 = vector.load %arg2[%c0_8, %c1, %c0_9, %c0_10] : memref<1x4x2x128xf32, #tpu.memory_space<vmem>>, vector<1x1x2x128xf32>
    %9 = vector.shape_cast %8 : vector<1x1x2x128xf32> to vector<2x128xf32>
    %10 = arith.cmpf ogt, %9, %6 : vector<2x128xf32>
    %c1_i32 = arith.constant 1 : i32
    %11 = vector.broadcast %c1_i32 : i32 to vector<2x128xi32>
    %12 = arith.select %10, %11, %7 : vector<2x128xi1>, vector<2x128xi32>
    %13 = arith.maximumf %9, %6 : vector<2x128xf32>
    %c0_11 = arith.constant 0 : index
    %c2 = arith.constant 2 : index
    %c0_12 = arith.constant 0 : index
    %c0_13 = arith.constant 0 : index
    %14 = vector.load %arg2[%c0_11, %c2, %c0_12, %c0_13] : memref<1x4x2x128xf32, #tpu.memory_space<vmem>>, vector<1x1x2x128xf32>
    %15 = vector.shape_cast %14 : vector<1x1x2x128xf32> to vector<2x128xf32>
    %16 = arith.cmpf ogt, %15, %13 : vector<2x128xf32>
    %c2_i32 = arith.constant 2 : i32
    %17 = vector.broadcast %c2_i32 : i32 to vector<2x128xi32>
    %18 = arith.select %16, %17, %12 : vector<2x128xi1>, vector<2x128xi32>
    %19 = arith.maximumf %15, %13 : vector<2x128xf32>
    %c0_14 = arith.constant 0 : index
    %c3 = arith.constant 3 : index
    %c0_15 = arith.constant 0 : index
    %c0_16 = arith.constant 0 : index
    %20 = vector.load %arg2[%c0_14, %c3, %c0_15, %c0_16] : memref<1x4x2x128xf32, #tpu.memory_space<vmem>>, vector<1x1x2x128xf32>
    %21 = vector.shape_cast %20 : vector<1x1x2x128xf32> to vector<2x128xf32>
    %22 = arith.cmpf ogt, %21, %19 : vector<2x128xf32>
    %c3_i32 = arith.constant 3 : i32
    %23 = vector.broadcast %c3_i32 : i32 to vector<2x128xi32>
    %24 = arith.select %22, %23, %18 : vector<2x128xi1>, vector<2x128xi32>
    %25 = arith.maximumf %21, %19 : vector<2x128xf32>
    %cst = arith.constant 0.000000e+00 : f32
    %26 = vector.broadcast %cst : f32 to vector<2x128xf32>
    %c0_17 = arith.constant 0 : index
    %c0_18 = arith.constant 0 : index
    %c0_19 = arith.constant 0 : index
    %c0_20 = arith.constant 0 : index
    %27 = vector.load %arg2[%c0_17, %c0_18, %c0_19, %c0_20] : memref<1x4x2x128xf32, #tpu.memory_space<vmem>>, vector<1x1x2x128xf32>
    %28 = vector.shape_cast %27 : vector<1x1x2x128xf32> to vector<2x128xf32>
    %29 = arith.subf %28, %25 : vector<2x128xf32>
    %30 = math.exp %29 : vector<2x128xf32>
    %31 = arith.addf %26, %30 : vector<2x128xf32>
    %c0_i32_21 = arith.constant 0 : i32
    %32 = vector.broadcast %c0_i32_21 : i32 to vector<2x128xi32>
    %33 = arith.cmpi eq, %4, %32 : vector<2x128xi32>
    %cst_22 = arith.constant 1.000000e+00 : f32
    %cst_23 = arith.constant 0.000000e+00 : f32
    %34 = vector.broadcast %cst_22 : f32 to vector<2x128xf32>
    %35 = vector.broadcast %cst_23 : f32 to vector<2x128xf32>
    %36 = arith.select %33, %34, %35 : vector<2x128xi1>, vector<2x128xf32>
    %cst_24 = arith.constant dense<0.000000e+00> : vector<128xf32>
    %37 = vector.multi_reduction <add>, %36, %cst_24 [0] : vector<2x128xf32> to vector<128xf32>
    %38 = vector.shape_cast %37 : vector<128xf32> to vector<1x128xf32>
    %cst_25 = arith.constant 0.000000e+00 : f32
    %39 = vector.broadcast %cst_25 : f32 to vector<2x128xf32>
    %40 = arith.select %33, %28, %39 : vector<2x128xi1>, vector<2x128xf32>
    %cst_26 = arith.constant dense<0.000000e+00> : vector<128xf32>
    %41 = vector.multi_reduction <add>, %40, %cst_26 [0] : vector<2x128xf32> to vector<128xf32>
    %42 = vector.shape_cast %41 : vector<128xf32> to vector<1x128xf32>
    %c0_27 = arith.constant 0 : index
    %c1_28 = arith.constant 1 : index
    %c0_29 = arith.constant 0 : index
    %c0_30 = arith.constant 0 : index
    %43 = vector.load %arg2[%c0_27, %c1_28, %c0_29, %c0_30] : memref<1x4x2x128xf32, #tpu.memory_space<vmem>>, vector<1x1x2x128xf32>
    %44 = vector.shape_cast %43 : vector<1x1x2x128xf32> to vector<2x128xf32>
    %45 = arith.subf %44, %25 : vector<2x128xf32>
    %46 = math.exp %45 : vector<2x128xf32>
    %47 = arith.addf %31, %46 : vector<2x128xf32>
    %c1_i32_31 = arith.constant 1 : i32
    %48 = vector.broadcast %c1_i32_31 : i32 to vector<2x128xi32>
    %49 = arith.cmpi eq, %4, %48 : vector<2x128xi32>
    %cst_32 = arith.constant 1.000000e+00 : f32
    %cst_33 = arith.constant 0.000000e+00 : f32
    %50 = vector.broadcast %cst_32 : f32 to vector<2x128xf32>
    %51 = vector.broadcast %cst_33 : f32 to vector<2x128xf32>
    %52 = arith.select %49, %50, %51 : vector<2x128xi1>, vector<2x128xf32>
    %cst_34 = arith.constant dense<0.000000e+00> : vector<128xf32>
    %53 = vector.multi_reduction <add>, %52, %cst_34 [0] : vector<2x128xf32> to vector<128xf32>
    %54 = vector.shape_cast %53 : vector<128xf32> to vector<1x128xf32>
    %cst_35 = arith.constant 0.000000e+00 : f32
    %55 = vector.broadcast %cst_35 : f32 to vector<2x128xf32>
    %56 = arith.select %49, %44, %55 : vector<2x128xi1>, vector<2x128xf32>
    %cst_36 = arith.constant dense<0.000000e+00> : vector<128xf32>
    %57 = vector.multi_reduction <add>, %56, %cst_36 [0] : vector<2x128xf32> to vector<128xf32>
    %58 = vector.shape_cast %57 : vector<128xf32> to vector<1x128xf32>
    %c0_37 = arith.constant 0 : index
    %c2_38 = arith.constant 2 : index
    %c0_39 = arith.constant 0 : index
    %c0_40 = arith.constant 0 : index
    %59 = vector.load %arg2[%c0_37, %c2_38, %c0_39, %c0_40] : memref<1x4x2x128xf32, #tpu.memory_space<vmem>>, vector<1x1x2x128xf32>
    %60 = vector.shape_cast %59 : vector<1x1x2x128xf32> to vector<2x128xf32>
    %61 = arith.subf %60, %25 : vector<2x128xf32>
    %62 = math.exp %61 : vector<2x128xf32>
    %63 = arith.addf %47, %62 : vector<2x128xf32>
    %c2_i32_41 = arith.constant 2 : i32
    %64 = vector.broadcast %c2_i32_41 : i32 to vector<2x128xi32>
    %65 = arith.cmpi eq, %4, %64 : vector<2x128xi32>
    %cst_42 = arith.constant 1.000000e+00 : f32
    %cst_43 = arith.constant 0.000000e+00 : f32
    %66 = vector.broadcast %cst_42 : f32 to vector<2x128xf32>
    %67 = vector.broadcast %cst_43 : f32 to vector<2x128xf32>
    %68 = arith.select %65, %66, %67 : vector<2x128xi1>, vector<2x128xf32>
    %cst_44 = arith.constant dense<0.000000e+00> : vector<128xf32>
    %69 = vector.multi_reduction <add>, %68, %cst_44 [0] : vector<2x128xf32> to vector<128xf32>
    %70 = vector.shape_cast %69 : vector<128xf32> to vector<1x128xf32>
    %cst_45 = arith.constant 0.000000e+00 : f32
    %71 = vector.broadcast %cst_45 : f32 to vector<2x128xf32>
    %72 = arith.select %65, %60, %71 : vector<2x128xi1>, vector<2x128xf32>
    %cst_46 = arith.constant dense<0.000000e+00> : vector<128xf32>
    %73 = vector.multi_reduction <add>, %72, %cst_46 [0] : vector<2x128xf32> to vector<128xf32>
    %74 = vector.shape_cast %73 : vector<128xf32> to vector<1x128xf32>
    %c0_47 = arith.constant 0 : index
    %c3_48 = arith.constant 3 : index
    %c0_49 = arith.constant 0 : index
    %c0_50 = arith.constant 0 : index
    %75 = vector.load %arg2[%c0_47, %c3_48, %c0_49, %c0_50] : memref<1x4x2x128xf32, #tpu.memory_space<vmem>>, vector<1x1x2x128xf32>
    %76 = vector.shape_cast %75 : vector<1x1x2x128xf32> to vector<2x128xf32>
    %77 = arith.subf %76, %25 : vector<2x128xf32>
    %78 = math.exp %77 : vector<2x128xf32>
    %79 = arith.addf %63, %78 : vector<2x128xf32>
    %c3_i32_51 = arith.constant 3 : i32
    %80 = vector.broadcast %c3_i32_51 : i32 to vector<2x128xi32>
    %81 = arith.cmpi eq, %4, %80 : vector<2x128xi32>
    %cst_52 = arith.constant 1.000000e+00 : f32
    %cst_53 = arith.constant 0.000000e+00 : f32
    %82 = vector.broadcast %cst_52 : f32 to vector<2x128xf32>
    %83 = vector.broadcast %cst_53 : f32 to vector<2x128xf32>
    %84 = arith.select %81, %82, %83 : vector<2x128xi1>, vector<2x128xf32>
    %cst_54 = arith.constant dense<0.000000e+00> : vector<128xf32>
    %85 = vector.multi_reduction <add>, %84, %cst_54 [0] : vector<2x128xf32> to vector<128xf32>
    %86 = vector.shape_cast %85 : vector<128xf32> to vector<1x128xf32>
    %cst_55 = arith.constant 0.000000e+00 : f32
    %87 = vector.broadcast %cst_55 : f32 to vector<2x128xf32>
    %88 = arith.select %81, %76, %87 : vector<2x128xi1>, vector<2x128xf32>
    %cst_56 = arith.constant dense<0.000000e+00> : vector<128xf32>
    %89 = vector.multi_reduction <add>, %88, %cst_56 [0] : vector<2x128xf32> to vector<128xf32>
    %90 = vector.shape_cast %89 : vector<128xf32> to vector<1x128xf32>
    %91 = math.log %79 : vector<2x128xf32>
    %92 = arith.addf %25, %91 : vector<2x128xf32>
    %93 = arith.cmpi ne, %24, %4 : vector<2x128xi32>
    %c0_57 = arith.constant 0 : index
    %c0_58 = arith.constant 0 : index
    %94 = vector.load %arg9[%c0_57, %c0_58] : memref<1x128xf32, #tpu.memory_space<vmem>>, vector<1x128xf32>
    %cst_59 = arith.constant 1.000000e+00 : f32
    %cst_60 = arith.constant 0.000000e+00 : f32
    %95 = vector.broadcast %cst_59 : f32 to vector<2x128xf32>
    %96 = vector.broadcast %cst_60 : f32 to vector<2x128xf32>
    %97 = arith.select %93, %95, %96 : vector<2x128xi1>, vector<2x128xf32>
    %cst_61 = arith.constant dense<0.000000e+00> : vector<128xf32>
    %98 = vector.multi_reduction <add>, %97, %cst_61 [0] : vector<2x128xf32> to vector<128xf32>
    %99 = vector.shape_cast %98 : vector<128xf32> to vector<1x128xf32>
    %100 = arith.addf %94, %99 : vector<1x128xf32>
    %c0_62 = arith.constant 0 : index
    %c0_63 = arith.constant 0 : index
    %101 = vector.load %arg9[%c0_62, %c0_63] : memref<1x128xf32, #tpu.memory_space<vmem>>, vector<1x128xf32>
    tpu.vector_store %arg9[%c0_62, %c0_63], %100 {strides = array<i32>} : memref<1x128xf32, #tpu.memory_space<vmem>>, vector<1x128xf32>,
    %c0_i32_64 = arith.constant 0 : i32
    %102 = vector.broadcast %c0_i32_64 : i32 to vector<2x128xi32>
    %103 = arith.cmpi eq, %4, %102 : vector<2x128xi32>
    %cst_65 = arith.constant 0.000000e+00 : f32
    %104 = vector.broadcast %cst_65 : f32 to vector<2x128xf32>
    %105 = arith.select %103, %92, %104 : vector<2x128xi1>, vector<2x128xf32>
    %cst_66 = arith.constant dense<0.000000e+00> : vector<128xf32>
    %106 = vector.multi_reduction <add>, %105, %cst_66 [0] : vector<2x128xf32> to vector<128xf32>
    %107 = vector.shape_cast %106 : vector<128xf32> to vector<1x128xf32>
    %c1_i32_67 = arith.constant 1 : i32
    %108 = vector.broadcast %c1_i32_67 : i32 to vector<2x128xi32>
    %109 = arith.cmpi eq, %4, %108 : vector<2x128xi32>
    %cst_68 = arith.constant 0.000000e+00 : f32
    %110 = vector.broadcast %cst_68 : f32 to vector<2x128xf32>
    %111 = arith.select %109, %92, %110 : vector<2x128xi1>, vector<2x128xf32>
    %cst_69 = arith.constant dense<0.000000e+00> : vector<128xf32>
    %112 = vector.multi_reduction <add>, %111, %cst_69 [0] : vector<2x128xf32> to vector<128xf32>
    %113 = vector.shape_cast %112 : vector<128xf32> to vector<1x128xf32>
    %c2_i32_70 = arith.constant 2 : i32
    %114 = vector.broadcast %c2_i32_70 : i32 to vector<2x128xi32>
    %115 = arith.cmpi eq, %4, %114 : vector<2x128xi32>
    %cst_71 = arith.constant 0.000000e+00 : f32
    %116 = vector.broadcast %cst_71 : f32 to vector<2x128xf32>
    %117 = arith.select %115, %92, %116 : vector<2x128xi1>, vector<2x128xf32>
    %cst_72 = arith.constant dense<0.000000e+00> : vector<128xf32>
    %118 = vector.multi_reduction <add>, %117, %cst_72 [0] : vector<2x128xf32> to vector<128xf32>
    %119 = vector.shape_cast %118 : vector<128xf32> to vector<1x128xf32>
    %c3_i32_73 = arith.constant 3 : i32
    %120 = vector.broadcast %c3_i32_73 : i32 to vector<2x128xi32>
    %121 = arith.cmpi eq, %4, %120 : vector<2x128xi32>
    %cst_74 = arith.constant 0.000000e+00 : f32
    %122 = vector.broadcast %cst_74 : f32 to vector<2x128xf32>
    %123 = arith.select %121, %92, %122 : vector<2x128xi1>, vector<2x128xf32>
    %cst_75 = arith.constant dense<0.000000e+00> : vector<128xf32>
    %124 = vector.multi_reduction <add>, %123, %cst_75 [0] : vector<2x128xf32> to vector<128xf32>
    %125 = vector.shape_cast %124 : vector<128xf32> to vector<1x128xf32>
    %c0_76 = arith.constant 0 : index
    %c0_77 = arith.constant 0 : index
    %126 = vector.load %arg7[%c0_76, %c0_77] : memref<4x128xf32, #tpu.memory_space<vmem>>, vector<4x128xf32>
    %127 = tpu.concatenate %38, %54, %70, %86 in 0 : vector<1x128xf32>, vector<1x128xf32>, vector<1x128xf32>, vector<1x128xf32> -> vector<4x128xf32>
    %128 = arith.addf %126, %127 : vector<4x128xf32>
    %c0_78 = arith.constant 0 : index
    %c0_79 = arith.constant 0 : index
    %129 = vector.load %arg7[%c0_78, %c0_79] : memref<4x128xf32, #tpu.memory_space<vmem>>, vector<4x128xf32>
    tpu.vector_store %arg7[%c0_78, %c0_79], %128 {strides = array<i32>} : memref<4x128xf32, #tpu.memory_space<vmem>>, vector<4x128xf32>,
    %c0_80 = arith.constant 0 : index
    %c0_81 = arith.constant 0 : index
    %130 = vector.load %arg8[%c0_80, %c0_81] : memref<4x128xf32, #tpu.memory_space<vmem>>, vector<4x128xf32>
    %131 = tpu.concatenate %107, %113, %119, %125 in 0 : vector<1x128xf32>, vector<1x128xf32>, vector<1x128xf32>, vector<1x128xf32> -> vector<4x128xf32>
    %132 = tpu.concatenate %42, %58, %74, %90 in 0 : vector<1x128xf32>, vector<1x128xf32>, vector<1x128xf32>, vector<1x128xf32> -> vector<4x128xf32>
    %133 = arith.subf %131, %132 : vector<4x128xf32>
    %134 = arith.addf %130, %133 : vector<4x128xf32>
    %c0_82 = arith.constant 0 : index
    %c0_83 = arith.constant 0 : index
    %135 = vector.load %arg8[%c0_82, %c0_83] : memref<4x128xf32, #tpu.memory_space<vmem>>, vector<4x128xf32>
    tpu.vector_store %arg8[%c0_82, %c0_83], %134 {strides = array<i32>} : memref<4x128xf32, #tpu.memory_space<vmem>>, vector<4x128xf32>,
    %c0_i32_84 = arith.constant 0 : i32
    %136 = arith.cmpi eq, %arg1, %c0_i32_84 : i32
    %137 = arith.extui %136 : i1 to i32
    %c0_i32_85 = arith.constant 0 : i32
    %138 = arith.cmpi ne, %137, %c0_i32_85 : i32
    scf.if %138 {
      %c0_86 = arith.constant 0 : index
      %c0_87 = arith.constant 0 : index
      %139 = vector.load %arg7[%c0_86, %c0_87] : memref<4x128xf32, #tpu.memory_space<vmem>>, vector<4x128xf32>
      %c0_88 = arith.constant 0 : index
      %c0_89 = arith.constant 0 : index
      %c0_90 = arith.constant 0 : index
      %140 = vector.load %arg4[%c0_88, %c0_89, %c0_90] : memref<1x4x128xf32, #tpu.memory_space<vmem>>, vector<1x4x128xf32>
      %141 = vector.shape_cast %140 : vector<1x4x128xf32> to vector<4x128xf32>
      %142 = vector.shape_cast %139 : vector<4x128xf32> to vector<1x4x128xf32>
      tpu.vector_store %arg4[%c0_88, %c0_89, %c0_90], %142 {strides = array<i32>} : memref<1x4x128xf32, #tpu.memory_space<vmem>>, vector<1x4x128xf32>,
      %c0_91 = arith.constant 0 : index
      %c0_92 = arith.constant 0 : index
      %143 = vector.load %arg8[%c0_91, %c0_92] : memref<4x128xf32, #tpu.memory_space<vmem>>, vector<4x128xf32>
      %c0_93 = arith.constant 0 : index
      %c0_94 = arith.constant 0 : index
      %c0_95 = arith.constant 0 : index
      %144 = vector.load %arg5[%c0_93, %c0_94, %c0_95] : memref<1x4x128xf32, #tpu.memory_space<vmem>>, vector<1x4x128xf32>
      %145 = vector.shape_cast %144 : vector<1x4x128xf32> to vector<4x128xf32>
      %146 = vector.shape_cast %143 : vector<4x128xf32> to vector<1x4x128xf32>
      tpu.vector_store %arg5[%c0_93, %c0_94, %c0_95], %146 {strides = array<i32>} : memref<1x4x128xf32, #tpu.memory_space<vmem>>, vector<1x4x128xf32>,
      %c0_96 = arith.constant 0 : index
      %c0_97 = arith.constant 0 : index
      %147 = vector.load %arg9[%c0_96, %c0_97] : memref<1x128xf32, #tpu.memory_space<vmem>>, vector<1x128xf32>
      %c0_98 = arith.constant 0 : index
      %c0_99 = arith.constant 0 : index
      %c0_100 = arith.constant 0 : index
      %148 = vector.load %arg6[%c0_98, %c0_99, %c0_100] : memref<1x1x128xf32, #tpu.memory_space<vmem>>, vector<1x1x128xf32>
      %149 = vector.shape_cast %148 : vector<1x1x128xf32> to vector<1x128xf32>
      %150 = vector.shape_cast %147 : vector<1x128xf32> to vector<1x1x128xf32>
      tpu.vector_store %arg6[%c0_98, %c0_99, %c0_100], %150 {strides = array<i32>} : memref<1x1x128xf32, #tpu.memory_space<vmem>>, vector<1x1x128xf32>,
    } else {
    }
    return
  }
  func.func @transform_0(%arg0: i32, %arg1: i32) -> (i32, i32, i32, i32) {
    %c0_i32 = arith.constant 0 : i32
    %c0_i32_0 = arith.constant 0 : i32
    %c0_i32_1 = arith.constant 0 : i32
    return %arg0, %c0_i32, %arg1, %c0_i32_0 : i32, i32, i32, i32
  }
  func.func @transform_1(%arg0: i32, %arg1: i32) -> (i32, i32, i32) {
    %c0_i32 = arith.constant 0 : i32
    %c0_i32_0 = arith.constant 0 : i32
    return %arg0, %arg1, %c0_i32 : i32, i32, i32
  }
  func.func @transform_2(%arg0: i32, %arg1: i32) -> (i32, i32, i32) {
    %c0_i32 = arith.constant 0 : i32
    %c0_i32_0 = arith.constant 0 : i32
    %c0_i32_1 = arith.constant 0 : i32
    return %arg0, %c0_i32, %c0_i32_0 : i32, i32, i32
  }
  func.func @transform_3(%arg0: i32, %arg1: i32) -> (i32, i32, i32) {
    %c0_i32 = arith.constant 0 : i32
    %c0_i32_0 = arith.constant 0 : i32
    %c0_i32_1 = arith.constant 0 : i32
    return %arg0, %c0_i32, %c0_i32_0 : i32, i32, i32
  }
  func.func @transform_4(%arg0: i32, %arg1: i32) -> (i32, i32, i32) {
    %c0_i32 = arith.constant 0 : i32
    %c0_i32_0 = arith.constant 0 : i32
    %c0_i32_1 = arith.constant 0 : i32
    return %arg0, %c0_i32, %c0_i32_0 : i32, i32, i32
  }
}

</mosaic_0001>

<bundles_post_ra>
// kernel: tpu_custom_call.1
= control target key start
LH: loop header
LB: loop body
LE: loop exit
PB: predicated region body
PF: predicated region fallthrough
CT: control target
= control target key end

     0   :  { %s1410_s0 = inlined_call_operand.hbm [shape: f32[2,4,2,128], index: 0, kind: input, shape index: {}]   ;;  %s1411_s1 = inlined_call_operand.hbm [shape: s32[2,2,128], index: 1, kind: input, shape index: {}]   ;;  %s1412_s2 = inlined_call_operand.hbm [shape: f32[2,4,128], index: 2, kind: output, shape index: {0}]   ;;  %s1413_s3 = inlined_call_operand.hbm [shape: f32[2,4,128], index: 3, kind: output, shape index: {1}]   ;;  %s1414_s4 = inlined_call_operand.hbm [shape: f32[2,1,128], index: 4, kind: output, shape index: {2}]  }
   0x1   :  { %1418 = sst [smem:[#allocation18_spill]] %s1410_s0 }
   0x2   :  { %10 = vsyncpa [#allocation6], 0 }
   0x3   :  { %12 = vsyncpa [#allocation6 + $0x1], 0 }
   0x4   :  { %13 = vsyncpa [#allocation9], 0 }
   0x5   :  { %15 = vsyncpa [#allocation9 + $0x1], 0 }
   0x6   :  { %16 = vsyncpa [#allocation7], 0 }
   0x7   :  { %18 = vsyncpa [#allocation7 + $0x1], 0 }
   0x8   :  { %19 = vsyncpa [#allocation12], 0 }
   0x9   :  { %21 = vsyncpa [#allocation12 + $0x1], 0  ;;  %s1039_s15 = smov 0   ;;  %s1041_s16 = smov 0  }
   0xa   :  { %s1043_s17 = smov 0   ;;  %s1045_s18 = smov 0  }
   0xb   :  { %s1047_s19 = smov 0   ;;  %s1049_s20 = smov 0  }
   0xc LB: > { %s1070_s21 = sadd.s32 4294967295, %s1003_s20   ;;  %s1416_s22 = sadd.s32 4294967294, %s1003_s20   ;;  %s1003_s20 = sphi %s1049_s20, %s27_s20   ;;  %s999_s19 = sphi %s1047_s19, %s1437_s19   ;;  %s995_s18 = sphi %s1045_s18, %s1436_s18   ;;  %s991_s17 = sphi %s1043_s17, %s1435_s17   ;;  %s987_s16 = sphi %s1041_s16, %s1434_s16   ;;  %s983_s15 = sphi %s1039_s15, %s1433_s15  }
   0xd   : > { %s39_s23 = sadd.s32 1, %s999_s19  ;;  %s48_s24 = sadd.s32 1, %s991_s17 }
   0xe   : > { %p41_p0 = scmp.ge.s32.totalorder %s39_s23, 2  ;;  %p55_p1 = scmp.ne.s32.totalorder %s991_s17, %s987_s16 }
   0xf   : > { %p56_p2 = scmp.eq.s32.totalorder %s1003_s20, 0  ;;  %p61_p3 = scmp.ne.s32.totalorder %s987_s16, %s983_s15 }
  0x10   : > { %s1439_s23 = smov (%p41_p0, %s39_s23), 0  ;;  %p62_p5 = scmp.eq.s32.totalorder %s1070_s21, 0 }
  0x11   : > { %p1082_p4 = por %p56_p2, %p55_p1  ;;  %s43_s26 = ssub.s32 %s999_s19, %s1439_s23 }
  0x12   : > { %p113_p6 = scmp.eq.s32.totalorder %s1070_s21, 1  ;;  %p46_p7 = scmp.eq.s32.totalorder %s43_s26, 0 }
  0x13   : > { %p1090_p8 = por %p62_p5, %p61_p3  ;;  %p119_p10 = scmp.eq.s32.totalorder %s1416_s22, 1 }
  0x14   : > { %p1094_p9 = por %p113_p6, %p55_p1  ;;  %p733_p13 = scmp.lt.s32.totalorder %s1003_s20, 2 }
  0x15   : > { %s1420_s27 = scalar_select %p1090_p8, 1, 0 }
  0x16   : > { %s1421_s28 = scalar_select %p1094_p9, 1, 0 }
  0x17   : > { %s1101_s29 = scalar_select %p46_p7, %s991_s17, %s48_s24  }
  0x18   : > { %p1103_p11 = por %p119_p10, %p61_p3  ;;  %s1110_s5 = sand.u32 1, %s991_s17  }
  0x19   : > { %s685_s6 = sshll.u32 %s1110_s5, 3  ;;  %s705_s7 = sshll.u32 %s999_s19, 7 }
  0x1a   : > { %s1422_s30 = scalar_select %p1103_p11, 1, 0 }
  0x1b   : > { %s1423_s0 = sld [smem:[#allocation18_spill]]  ;;  %s195_s11 = scalar_lea.vmem [#allocation5], %s685_s6 }
  0x1c   : > { %s203_s12 = sshll.u32 %s195_s11, 4  ;;  %p1123_p0 = pnand %p733_p13, %p1082_p4  ;;  %s1119_s12 = int_to_ptr.vmem [resolvable:$true] %s203_s12 }
  0x1d   : > { %s192_s14 = scalar_lea.sflag [#allocation6], %s1110_s5 }
  0x1e   : > { %p799_p3 = pneg %p1123_p0 }
  0x21   : > { %s1117_s10 = scalar_lea.hbm %s1423_s0, %s705_s7  ;;  %s802_s25 = scalar_lea.hbm %s1423_s0, 256 }
  0x22   : > { %s797_s24 = scalar_lea.hbm %s1117_s10, 128  ;;  %p803_p4 = scmp.lt.u32.totalorder %s1117_s10, %s1423_s0 }
  0x23   : > { %p798_p2 = scmp.ne.s32.totalorder %s1117_s10, %s797_s24  ;;  %p804_p7 = scmp.lt.u32.totalorder %s802_s25, %s797_s24 }
  0x24   : > { %p806_p13 = scmp.lt.u32.totalorder %s797_s24, %s1117_s10 }
  0x25   : > { %p800_p5 = pnand %p799_p3, %p798_p2  ;;  %p805_p10 = por %p804_p7, %p803_p4 }
  0x27   : > { %p801_p6 = pneg %p800_p5  ;;  %p807_p12 = por %p806_p13, %p805_p10 }
  0x29   : > { %p808_p1 = pnand %p807_p12, %p801_p6 }
  0x2b   : > { %811 = shalt.err (!%p808_p1)
}
  0x2c   : > { %s812_s9 = scalar_lea.vmem %s1119_s12, 128  ;;  %s1005_s11 = smov [#allocation5]  }
  0x2d   : > { %p813_p2 = scmp.ne.s32.totalorder %s1119_s12, %s812_s9  ;;  %s817_s26 = sshll.u32 %s1005_s11, 4  ;;  %s818_s26 = int_to_ptr.vmem [resolvable:$false] %s817_s26 }
  0x2e   : > { %s819_s6 = scalar_lea.vmem %s818_s26, 256  ;;  %p820_p9 = scmp.lt.s32.totalorder %s1119_s12, %s818_s26 }
  0x2f   : > { %p815_p5 = pnand %p813_p2, %p799_p3  ;;  %p821_p4 = scmp.lt.s32.totalorder %s819_s6, %s812_s9 }
  0x31   : > { %p816_p11 = pneg %p815_p5  ;;  %p822_p7 = por %p821_p4, %p820_p9 }
  0x33   : > { %p823_p10 = pnand %p822_p7, %p816_p11 }
  0x35   : > { %826 = shalt.err (!%p823_p10)
}
  0x36   : > { %s1006_s24 = smov 32   ;;  %s1007_s25 = smov 2  }
  0x37   : > { %719 = dma.hbm_to_vmem [thread:$0]  (!%p1123_p0), %s1117_s10, 128, %s1119_s12, %s192_s14, %s1006_s24, %s1006_s24, %s1007_s25  }
  0x38   : > { %p230_p12 = scmp.lt.s32.totalorder %s1003_s20, 3  ;;  %s688_s7 = sshll.u32 %s1110_s5, 1 }
  0x39   : > { %s689_s8 = sshll.u32 %s999_s19, 5  ;;  %p1425_p9 = scmp.ge.s32.totalorder %s1003_s20, 1 }
  0x3a   : > { %s1168_s6 = scalar_lea.hbm %s1411_s1, %s689_s8  ;;  %s217_s22 = scalar_lea.vmem [#allocation8], %s688_s7 }
  0x3b   : > { %p1161_p11 = pnand %p1425_p9, %p230_p12  ;;  %s225_s0 = sshll.u32 %s217_s22, 4  ;;  %s226_s0 = int_to_ptr.vmem [resolvable:$true] %s225_s0 }
  0x3c   : > { %s214_s10 = scalar_lea.sflag [#allocation9], %s1110_s5  ;;  %s827_s12 = scalar_lea.hbm %s1168_s6, 32 }
  0x3d   : > { %s1426_s9 = scalar_select %p1161_p11, 1, 0 }
  0x3e   : > { %p828_p1 = scmp.ne.s32.totalorder %s1168_s6, %s827_s12  ;;  %s832_s25 = scalar_lea.hbm %s1411_s1, 64 }
  0x3f   : > { %p833_p2 = scmp.lt.u32.totalorder %s1168_s6, %s1411_s1  ;;  %p834_p5 = scmp.lt.u32.totalorder %s832_s25, %s827_s12 }
  0x40   : > { %p830_p6 = pnand %p828_p1, %p799_p3  ;;  %p836_p7 = scmp.lt.u32.totalorder %s827_s12, %s1168_s6 }
  0x41   : > { %p835_p4 = por %p834_p5, %p833_p2 }
  0x42   : > { %p831_p13 = pneg %p830_p6 }
  0x43   : > { %p837_p10 = por %p836_p7, %p835_p4 }
  0x45   : > { %p838_p12 = pnand %p837_p10, %p831_p13 }
  0x47   : > { %841 = shalt.err (!%p838_p12)
}
  0x48   : > { %s842_s22 = scalar_lea.vmem %s226_s0, 32  ;;  %s1008_s5 = smov [#allocation8]  }
  0x49   : > { %p843_p9 = scmp.ne.s32.totalorder %s226_s0, %s842_s22  ;;  %s847_s7 = sshll.u32 %s1008_s5, 4  ;;  %s848_s7 = int_to_ptr.vmem [resolvable:$false] %s847_s7 }
  0x4a   : > { %s849_s26 = scalar_lea.vmem %s848_s7, 64  ;;  %p850_p8 = scmp.lt.s32.totalorder %s226_s0, %s848_s7 }
  0x4b   : > { %p845_p1 = pnand %p843_p9, %p799_p3  ;;  %p851_p11 = scmp.lt.s32.totalorder %s849_s26, %s842_s22 }
  0x4d   : > { %p846_p6 = pneg %p845_p1  ;;  %p852_p2 = por %p851_p11, %p850_p8 }
  0x4f   : > { %p853_p5 = pnand %p852_p2, %p846_p6 }
  0x51   : > { %856 = shalt.err (!%p853_p5)
}
  0x52   : > { %722 = dma.hbm_to_vmem [thread:$0]  (!%p1123_p0), %s1168_s6, 32, %s226_s0, %s214_s10  }
  0x53   : > { %p1427_p13 = scmp.ne.s32.totalorder %s1426_s9, 0 }
  0x54   : > { %s1193_s12 = sand.u32 (!%p1427_p13), 1, %s987_s16   ;;  %p1428_p3 = scmp.ne.s32.totalorder (!%p1427_p13), %s1420_s27, 0 }
  0x55   : > { %234 = sbr.rel (%p1427_p13) target bundleno = 217 (0xd9), region = 28  ;;  %s691_s14 = sshll.u32 (!%p1427_p13), %s1193_s12, 3 }
  0x56   : > { %s237_s24 = scalar_lea.sflag (!%p1427_p13), [#allocation6], %s1193_s12  ;;  %s240_s25 = scalar_lea.vmem (!%p1427_p13), [#allocation5], %s691_s14 }
  0x5c   : > { %966 = dma.done.wait (%p1428_p3), %s237_s24, 128  }
  0x5d   : > { %968 = vsyncadd (%p1428_p3), %s237_s24, 4294967168  ;;  %s692_s0 = sshll.u32 %s1193_s12, 1  ;;  %s246_s13 = scalar_lea.sflag [#allocation9], %s1193_s12 }
  0x5e   : > { %s249_s9 = scalar_lea.vmem [#allocation8], %s692_s0 }
  0x5f   : > { %970 = dma.done.wait (%p1428_p3), %s246_s13, 32  }
  0x60   : > { %972 = vsyncadd (%p1428_p3), %s246_s13, 4294967264  ;;  %v1009_v0 = vmov 0.0   ;;  %v296_v1 = vld [vmem:[%s240_s25] sm:$0x3]  ;;  %v695_v2 = vld [vmem:[%s240_s25 + $0x2] sm:$0x3] }
  0x61   : > { %293 = vst [vmem:[#allocation3] sm:$0xf] %v1009_v0  ;;  %292 = vst [vmem:[#allocation2] sm:$0xf] %v1009_v0  ;;  %v301_v3 = vmax.f32 %v695_v2, %v296_v1  ;;  %v1207_v4 = vld [vmem:[%s240_s25 + $0x4] sm:$0x3]  ;;  %vm299_vm0 = vcmp.gt.f32.partialorder %v695_v2, %v296_v1 }
  0x62   : > { %294 = vst [vmem:[#allocation4] sm:$0x1] %v1009_v0  ;;  %v1209_v5 = vld [vmem:[%s240_s25 + $0x6] sm:$0x3]  ;;  %v1215_v8 = vld [vmem:[%s249_s9] sm:$0x3] }
  0x63   : > { %v306_v6 = vmax.f32 %v1207_v4, %v301_v3  ;;  %v1010_v13 = vmov 0   ;;  %vm304_vm1 = vcmp.gt.f32.partialorder %v1207_v4, %v301_v3  ;;  %vm316_vm2 = vcmp.eq.s32.totalorder %v1215_v8, 0  ;;  %s693_s27 = sshll.u32 %s1193_s12, 2  ;;  %s700_s8 = sshll.u32 %s995_s18, 6 }
  0x64   : > { %v300_v14 = vsel %vm299_vm0, 1, %v1010_v13  ;;  %v317_v20 = vsel %vm316_vm2, 1.0, %v1009_v0  ;;  %vm318_vm4 = vcmask 1041408   ;;  %vm338_vm5 = vcmp.eq.s32.totalorder %v1215_v8, 1  ;;  %s274_s6 = scalar_lea.vmem [#allocation10], %s693_s27  ;;  %s287_s11 = scalar_lea.vmem [#allocation13], %s1193_s12 }
  0x65   : > { %v1213_v7 = vmax.f32 %v1209_v5, %v306_v6  ;;  %vm309_vm3 = vcmp.gt.f32.partialorder %v1209_v5, %v306_v6  ;;  %v305_v19 = vsel %vm304_vm1, 2, %v300_v14  ;;  %v319_v22 = vsel %vm318_vm4, %v317_v20, 0.0  ;;  %s494_s10 = sshll.u32 %s274_s6, 4  ;;  %s1275_s7 = scalar_lea.hbm %s1412_s2, %s700_s8  ;;  %s1267_s10 = int_to_ptr.vmem [resolvable:$true] %s494_s10 }
  0x66   : > { %v310_v21 = vsel %vm309_vm3, 3, %v305_v19  ;;  %v320_v23 = vrot.slane %v319_v22, 4  ;;  %v339_v24 = vsel %vm338_vm5, 1.0, %v1009_v0  ;;  %vm359_vm7 = vcmp.eq.s32.totalorder %v1215_v8, 2  ;;  %s472_s26 = scalar_lea.sflag [#allocation7], %s1193_s12  ;;  %s857_s14 = scalar_lea.vmem %s1267_s10, 64 }
  0x67   : > { %v312_v9 = vsub.f32 %v296_v1, %v1213_v7  ;;  %v334_v10 = vsub.f32 %v695_v2, %v1213_v7  ;;  %v355_v11 = vsub.f32 %v1207_v4, %v1213_v7  ;;  %v376_v12 = vsub.f32 %v1209_v5, %v1213_v7  ;;  %p858_p8 = scmp.ne.s32.totalorder %s1267_s10, %s857_s14  ;;  %p1429_p0 = scmp.ne.s32.totalorder %s1421_s28, 0 }
  0x68   : > { %vm400_vm6 = vcmp.ne.s32.totalorder %v310_v21, %v1215_v8  ;;  %v340_v26 = vsel %vm318_vm4, %v339_v24, 0.0  ;;  %vm380_vm8 = vcmp.eq.s32.totalorder %v1215_v8, 3  ;;  %v321_v28 = vadd.f32 %v320_v23, %v319_v22  ;;  %v444_v23 = vld [vmem:[#allocation2] sm:$0xf]  ;;  %s1011_s24 = smov [#allocation10]  }
  0x69   : > { %v313_v15 = vmul.f32 1.442695, %v312_v9  ;;  %v335_v16 = vmul.f32 1.442695, %v334_v10  ;;  %v356_v17 = vmul.f32 1.442695, %v355_v11  ;;  %p859_p11 = pnand %p858_p8, %p1429_p0 }
  0x6a   : > { %v377_v18 = vmul.f32 1.442695, %v376_v12  ;;  %v402_v25 = vsel %vm400_vm6, 1.0, %v1009_v0  ;;  %v341_v29 = vrot.slane %v340_v26, 4  ;;  %v326_v30 = vsel %vm316_vm2, %v296_v1, 0.0  ;;  %s861_s25 = sshll.u32 %s1011_s24, 4  ;;  %s862_s25 = int_to_ptr.vmem [resolvable:$false] %s861_s25 }
  0x6b   : > { %787 = vpow2.f32 %v313_v15  ;;  %v403_v27 = vsel %vm318_vm4, %v402_v25, 0.0  ;;  %v360_v32 = vsel %vm359_vm7, 1.0, %v1009_v0  ;;  %v381_v33 = vsel %vm380_vm8, 1.0, %v1009_v0  ;;  %v401_v10 = vld [vmem:[#allocation4] sm:$0x1]  ;;  %p860_p4 = pneg %p859_p11  ;;  %s863_s0 = scalar_lea.vmem %s862_s25, 128 }
  0x6c   : > { %789 = vpow2.f32 %v335_v16  ;;  %v404_v31 = vrot.slane %v403_v27, 4  ;;  %v347_v34 = vsel %vm338_vm5, %v695_v2, 0.0  ;;  %v322_v35 = vrot.slane %v321_v28, 2  ;;  %p864_p7 = scmp.lt.s32.totalorder %s1267_s10, %s862_s25  ;;  %p865_p10 = scmp.lt.s32.totalorder %s863_s0, %s857_s14 }
  0x6d   : > { %791 = vpow2.f32 %v356_v17  ;;  %v342_v36 = vadd.f32 %v341_v29, %v340_v26  ;;  %v361_v37 = vsel %vm318_vm4, %v360_v32, 0.0  ;;  %v382_v40 = vsel %vm318_vm4, %v381_v33, 0.0 }
  0x6e   : > { %793 = vpow2.f32 %v377_v18  ;;  %v405_v38 = vadd.f32 %v404_v31, %v403_v27  ;;  %v362_v39 = vrot.slane %v361_v37, 4  ;;  %v323_v42 = vadd.f32 %v322_v35, %v321_v28  ;;  %p866_p12 = por %p865_p10, %p864_p7 }
  0x6f   : > { %v343_v43 = vrot.slane %v342_v36, 2  ;;  %v383_v44 = vrot.slane %v382_v40, 4  ;;  %v327_v46 = vsel %vm318_vm4, %v326_v30, 0.0  ;;  %v348_v47 = vsel %vm318_vm4, %v347_v34, 0.0 }
  0x70   : > { %v406_v48 = vrot.slane %v405_v38, 2  ;;  %v363_v49 = vadd.f32 %v362_v39, %v361_v37  ;;  %v324_v52 = vrot.slane %v323_v42, 1  ;;  %v368_v56 = vsel %vm359_vm7, %v1207_v4, 0.0  ;;  %p867_p9 = pnand %p866_p12, %p860_p4 }
  0x71   : > { %v344_v53 = vadd.f32 %v343_v43, %v342_v36  ;;  %v384_v54 = vadd.f32 %v383_v44, %v382_v40  ;;  %v389_v57 = vsel %vm380_vm8, %v1209_v5, 0.0  ;;  %v328_v0 = vrot.slane %v327_v46, 4 }
  0x72   : > { %v407_v58 = vadd.f32 %v406_v48, %v405_v38  ;;  %v364_v59 = vrot.slane %v363_v49, 2  ;;  %v325_v61 = vadd.f32 %v324_v52, %v323_v42  ;;  %v349_v1 = vrot.slane %v348_v47, 4 }
  0x73   : > { %v345_v62 = vrot.slane %v344_v53, 1  ;;  %v385_v63 = vrot.slane %v384_v54, 2  ;;  %v369_v6 = vsel %vm318_vm4, %v368_v56, 0.0  ;;  %v390_v12 = vsel %vm318_vm4, %v389_v57, 0.0 }
  0x74   : > { %v408_v2 = vrot.slane %v407_v58, 1  ;;  %v365_v3 = vadd.f32 %v364_v59, %v363_v49  ;;  %vm445_vm9 = vcmask 1040384   ;;  %v370_v16 = vrot.slane %v369_v6, 4 }
  0x75   : > { %v788_v41 = vpop.eup %787  ;;  %v346_v11 = vadd.f32 %v345_v62, %v344_v53  ;;  %v386_v4 = vadd.f32 %v385_v63, %v384_v54  ;;  %v329_v19 = vadd.f32 %v328_v0, %v327_v46  ;;  %v350_v20 = vadd.f32 %v349_v1, %v348_v47 }
  0x76   : > { %v790_v45 = vpop.eup %789  ;;  %v409_v5 = vadd.f32 %v408_v2, %v407_v58  ;;  %v366_v13 = vrot.slane %v365_v3, 1  ;;  %v391_v21 = vrot.slane %v390_v12, 4  ;;  %vm448_vm10 = vcmask 1042432  }
  0x77   : > { %v792_v50 = vpop.eup %791  ;;  %v337_v51 = vadd.f32 %v790_v45, %v788_v41  ;;  %v387_v14 = vrot.slane %v386_v4, 1  ;;  %v446_v15 = vsel %vm445_vm9, %v325_v61, %v346_v11  ;;  %v330_v27 = vrot.slane %v329_v19, 2 }
  0x78   : > { %v794_v55 = vpop.eup %793  ;;  %v410_v17 = vadd.f32 %v409_v5, %v401_v10  ;;  %v367_v18 = vadd.f32 %v366_v13, %v365_v3  ;;  %v351_v28 = vrot.slane %v350_v20, 2  ;;  %v371_v29 = vadd.f32 %v370_v16, %v369_v6 }
  0x79   : > { %v358_v60 = vadd.f32 %v792_v50, %v337_v51  ;;  %v388_v22 = vadd.f32 %v387_v14, %v386_v4  ;;  %v392_v30 = vadd.f32 %v391_v21, %v390_v12  ;;  %v331_v32 = vadd.f32 %v330_v27, %v329_v19 }
  0x7a   : > { %411 = vst [vmem:[#allocation4] sm:$0x1] %v410_v17  ;;  %v447_v24 = vsel %vm318_vm4, %v446_v15, %v367_v18  ;;  %v352_v33 = vadd.f32 %v351_v28, %v350_v20  ;;  %v372_v34 = vrot.slane %v371_v29, 2 }
  0x7b   : > { %v379_v9 = vadd.f32 %v794_v55, %v358_v60  ;;  %v449_v25 = vsel %vm448_vm10, %v447_v24, %v388_v22  ;;  %v393_v35 = vrot.slane %v392_v30, 2  ;;  %v332_v39 = vrot.slane %v331_v32, 1 }
  0x7c   : > { %v450_v26 = vadd.f32 %v449_v25, %v444_v23  ;;  %v353_v40 = vrot.slane %v352_v33, 1  ;;  %v373_v41 = vadd.f32 %v372_v34, %v371_v29 }
  0x7d   : > { %795 = vlog2.f32 %v379_v9  ;;  %v394_v42 = vadd.f32 %v393_v35, %v392_v30 }
  0x7e   : > { %451 = vst [vmem:[#allocation2] sm:$0xf] %v450_v26 }
  0x81   : > { %v469_v36 = vld [vmem:[#allocation4] sm:$0x1] }
  0x82   : > { %470 = vst [vmem:[%s287_s11] sm:$0x1] %v469_v36 }
  0x85   : > { %v465_v43 = vld [vmem:[#allocation2] sm:$0xf] }
  0x86   : > { %466 = vst [vmem:[%s274_s6] sm:$0xf] %v465_v43 }
  0x87   : > { %v796_v31 = vpop.eup %795 }
  0x88   : > { %v398_v37 = vmul.f32 0.6931472, %v796_v31 }
  0x8a   : > { %v399_v38 = vadd.f32 %v398_v37, %v1213_v7 }
  0x8c   : > { %v412_v44 = vsel %vm316_vm2, %v399_v38, 0.0  ;;  %v420_v7 = vsel %vm338_vm5, %v399_v38, 0.0  ;;  %v428_v45 = vsel %vm359_vm7, %v399_v38, 0.0  ;;  %v436_v46 = vsel %vm380_vm8, %v399_v38, 0.0 }
  0x8d   : > { %v413_v47 = vsel %vm318_vm4, %v412_v44, 0.0  ;;  %v421_v48 = vsel %vm318_vm4, %v420_v7, 0.0  ;;  %v429_v49 = vsel %vm318_vm4, %v428_v45, 0.0  ;;  %v437_v50 = vsel %vm318_vm4, %v436_v46, 0.0 }
  0x8e   : > { %870 = shalt.err (!%p867_p9)
}
  0x8f   : > { %s871_s13 = scalar_lea.hbm %s1275_s7, 64  ;;  %s875_s22 = scalar_lea.hbm %s1412_s2, 128 }
  0x90   : > { %p872_p1 = scmp.ne.s32.totalorder %s1275_s7, %s871_s13  ;;  %p876_p5 = scmp.lt.u32.totalorder %s1275_s7, %s1412_s2 }
  0x91   : > { %p877_p13 = scmp.lt.u32.totalorder %s875_s22, %s871_s13  ;;  %p879_p8 = scmp.lt.u32.totalorder %s871_s13, %s1275_s7 }
  0x92   : > { %p873_p6 = pnand %p872_p1, %p1429_p0 }
  0x93   : > { %p878_p3 = por %p877_p13, %p876_p5 }
  0x94   : > { %p874_p2 = pneg %p873_p6 }
  0x95   : > { %p880_p11 = por %p879_p8, %p878_p3 }
  0x97   : > { %p881_p4 = pnand %p880_p11, %p874_p2 }
  0x99   : > { %884 = shalt.err (!%p881_p4)
}
  0x9a   : > { %710 = dma.vmem_to_hbm [thread:$0]  (%p1429_p0), %s1267_s10, 64, %s1275_s7, %s472_s26   ;;  %v414_v8 = vrot.slane %v413_v47, 4  ;;  %v422_v51 = vrot.slane %v421_v48, 4  ;;  %v430_v52 = vrot.slane %v429_v49, 4  ;;  %v438_v53 = vrot.slane %v437_v50, 4 }
  0x9b   : > { %v333_v54 = vadd.f32 %v332_v39, %v331_v32  ;;  %v354_v55 = vadd.f32 %v353_v40, %v352_v33  ;;  %v374_v56 = vrot.slane %v373_v41, 1  ;;  %v395_v61 = vrot.slane %v394_v42, 1  ;;  %v452_v23 = vld [vmem:[#allocation3] sm:$0xf]  ;;  %s281_s10 = scalar_lea.vmem [#allocation11], %s693_s27  ;;  %s476_s26 = sand.u32 1, %s1070_s21  }
  0x9c   : > { %v415_v57 = vadd.f32 %v414_v8, %v413_v47  ;;  %v423_v58 = vadd.f32 %v422_v51, %v421_v48  ;;  %v431_v59 = vadd.f32 %v430_v52, %v429_v49  ;;  %v439_v60 = vadd.f32 %v438_v53, %v437_v50  ;;  %s507_s7 = sshll.u32 %s281_s10, 4  ;;  %s520_s14 = sshll.u32 %s287_s11, 4  ;;  %s1323_s7 = int_to_ptr.vmem [resolvable:$true] %s507_s7  ;;  %s1332_s14 = int_to_ptr.vmem [resolvable:$true] %s520_s14 }
  0x9d   : > { %v375_v2 = vadd.f32 %v374_v56, %v373_v41  ;;  %v456_v3 = vsel %vm445_vm9, %v333_v54, %v354_v55  ;;  %v396_v4 = vadd.f32 %v395_v61, %v394_v42  ;;  %s702_s25 = sshll.u32 %s995_s18, 4  ;;  %s1330_s9 = scalar_lea.hbm %s1413_s3, %s700_s8 }
  0x9e   : > { %v416_v62 = vrot.slane %v415_v57, 2  ;;  %v424_v63 = vrot.slane %v423_v58, 2  ;;  %v432_v0 = vrot.slane %v431_v59, 2  ;;  %v440_v1 = vrot.slane %v439_v60, 2  ;;  %s1337_s21 = scalar_lea.hbm %s1414_s4, %s702_s25  ;;  %s1339_s12 = scalar_lea.sflag [#allocation12], %s476_s26 }
  0x9f   : > { %v457_v15 = vsel %vm318_vm4, %v456_v3, %v375_v2  ;;  %s885_s18 = scalar_lea.vmem %s1323_s7, 64  ;;  %s1012_s11 = smov [#allocation11]  }
  0xa0   : > { %v417_v6 = vadd.f32 %v416_v62, %v415_v57  ;;  %v425_v9 = vadd.f32 %v424_v63, %v423_v58  ;;  %v433_v10 = vadd.f32 %v432_v0, %v431_v59  ;;  %v441_v11 = vadd.f32 %v440_v1, %v439_v60  ;;  %p886_p7 = scmp.ne.s32.totalorder %s1323_s7, %s885_s18  ;;  %s889_s22 = sshll.u32 %s1012_s11, 4  ;;  %s890_s22 = int_to_ptr.vmem [resolvable:$false] %s889_s22 }
  0xa1   : > { %v458_v21 = vsel %vm448_vm10, %v457_v15, %v396_v4  ;;  %s891_s8 = scalar_lea.vmem %s890_s22, 128  ;;  %p892_p9 = scmp.lt.s32.totalorder %s1323_s7, %s890_s22 }
  0xa2   : > { %v418_v12 = vrot.slane %v417_v6, 1  ;;  %v426_v5 = vrot.slane %v425_v9, 1  ;;  %v434_v13 = vrot.slane %v433_v10, 1  ;;  %v442_v14 = vrot.slane %v441_v11, 1  ;;  %p887_p10 = pnand %p886_p7, %p1429_p0  ;;  %p893_p1 = scmp.lt.s32.totalorder %s891_s8, %s885_s18 }
  0xa4   : > { %v419_v16 = vadd.f32 %v418_v12, %v417_v6  ;;  %v427_v17 = vadd.f32 %v426_v5, %v425_v9  ;;  %v435_v18 = vadd.f32 %v434_v13, %v433_v10  ;;  %v443_v19 = vadd.f32 %v442_v14, %v441_v11  ;;  %p888_p12 = pneg %p887_p10  ;;  %p894_p6 = por %p893_p1, %p892_p9 }
  0xa6   : > { %v453_v20 = vsel %vm445_vm9, %v419_v16, %v427_v17  ;;  %p895_p2 = pnand %p894_p6, %p888_p12 }
  0xa7   : > { %v454_v22 = vsel %vm318_vm4, %v453_v20, %v435_v18 }
  0xa8   : > { %v455_v24 = vsel %vm448_vm10, %v454_v22, %v443_v19 }
  0xa9   : > { %v459_v25 = vsub.f32 %v455_v24, %v458_v21 }
  0xab   : > { %v460_v26 = vadd.f32 %v459_v25, %v452_v23 }
  0xad   : > { %461 = vst [vmem:[#allocation3] sm:$0xf] %v460_v26 }
  0xb4   : > { %v467_v27 = vld [vmem:[#allocation3] sm:$0xf] }
  0xb5   : > { %468 = vst [vmem:[%s281_s10] sm:$0xf] %v467_v27 }
  0xb6   : > { %898 = shalt.err (!%p895_p2)
}
  0xb7   : > { %s899_s5 = scalar_lea.hbm %s1330_s9, 64  ;;  %s903_s26 = scalar_lea.hbm %s1413_s3, 128 }
  0xb8   : > { %p900_p5 = scmp.ne.s32.totalorder %s1330_s9, %s899_s5  ;;  %p904_p8 = scmp.lt.u32.totalorder %s1330_s9, %s1413_s3 }
  0xb9   : > { %p905_p11 = scmp.lt.u32.totalorder %s903_s26, %s899_s5  ;;  %p907_p7 = scmp.lt.u32.totalorder %s899_s5, %s1330_s9 }
  0xba   : > { %p901_p13 = pnand %p900_p5, %p1429_p0 }
  0xbb   : > { %p906_p4 = por %p905_p11, %p904_p8 }
  0xbc   : > { %p902_p3 = pneg %p901_p13 }
  0xbd   : > { %p908_p10 = por %p907_p7, %p906_p4 }
  0xbf   : > { %p909_p12 = pnand %p908_p10, %p902_p3 }
  0xc1   : > { %912 = shalt.err (!%p909_p12)
}
  0xc2   : > { %711 = dma.vmem_to_hbm [thread:$0]  (%p1429_p0), %s1323_s7, 64, %s1330_s9, %s1339_s12  }
  0xc3   : > { %s913_s13 = scalar_lea.vmem %s1332_s14, 16  ;;  %s1013_s27 = smov [#allocation13]  }
  0xc4   : > { %p914_p9 = scmp.ne.s32.totalorder %s1332_s14, %s913_s13  ;;  %s917_s6 = sshll.u32 %s1013_s27, 4  ;;  %s918_s6 = int_to_ptr.vmem [resolvable:$false] %s917_s6 }
  0xc5   : > { %s919_s18 = scalar_lea.vmem %s918_s6, 32  ;;  %p920_p2 = scmp.lt.s32.totalorder %s1332_s14, %s918_s6 }
  0xc6   : > { %p915_p1 = pnand %p914_p9, %p1429_p0  ;;  %p921_p5 = scmp.lt.s32.totalorder %s919_s18, %s913_s13 }
  0xc8   : > { %p916_p6 = pneg %p915_p1  ;;  %p922_p13 = por %p921_p5, %p920_p2 }
  0xca   : > { %p923_p3 = pnand %p922_p13, %p916_p6 }
  0xcc   : > { %926 = shalt.err (!%p923_p3)
}
  0xcd   : > { %s927_s7 = scalar_lea.hbm %s1337_s21, 16  ;;  %s931_s22 = scalar_lea.hbm %s1414_s4, 32 }
  0xce   : > { %p928_p8 = scmp.ne.s32.totalorder %s1337_s21, %s927_s7  ;;  %p932_p7 = scmp.lt.u32.totalorder %s1337_s21, %s1414_s4 }
  0xcf   : > { %p933_p10 = scmp.lt.u32.totalorder %s931_s22, %s927_s7  ;;  %p935_p9 = scmp.lt.u32.totalorder %s927_s7, %s1337_s21 }
  0xd0   : > { %p929_p11 = pnand %p928_p8, %p1429_p0 }
  0xd1   : > { %p934_p12 = por %p933_p10, %p932_p7 }
  0xd2   : > { %p930_p4 = pneg %p929_p11 }
  0xd3   : > { %p936_p1 = por %p935_p9, %p934_p12 }
  0xd5   : > { %p937_p6 = pnand %p936_p1, %p930_p4 }
  0xd7   : > { %940 = shalt.err (!%p937_p6)
}
  0xd8   : > { %712 = dma.vmem_to_hbm [thread:$0]  (%p1429_p0), %s1332_s14, 16, %s1337_s21, %s1339_s12  }
  0xd9 PF: > { %s532_s24 = sand.u32 1, %s983_s15   ;;  %p1430_p2 = scmp.ne.s32.totalorder %s1422_s30, 0 }
  0xda   : > { %p1431_p5 = scmp.ge.s32.totalorder %s1003_s20, 2  ;;  %s533_s10 = scalar_lea.sflag [#allocation7], %s532_s24 }
  0xdc   : > { %p724_p13 = pnand %p1431_p5, %p1430_p2 }
  0xde   : > { %974 = dma.done.wait (!%p724_p13), %s533_s10, 64  }
  0xdf   : > { %976 = vsyncadd (!%p724_p13), %s533_s10, 4294967232  ;;  %s1432_s26 = sadd.s32 4294967294, %s1003_s20  }
  0xe0   : > { %s541_s25 = sand.u32 1, %s1432_s26  }
  0xe1   : > { %s542_s0 = scalar_lea.sflag [#allocation12], %s541_s25 }
  0xe2   : > { %978 = dma.done.wait (!%p724_p13), %s542_s0, 80  }
  0xe3   : > { %980 = vsyncadd (!%p724_p13), %s542_s0, 4294967216  ;;  %s27_s20 = sadd.s32 1, %s1003_s20   ;;  %s1433_s15 = smov %s987_s16 }
  0xe4   : > { %p24_p0 = scmp.ge.s32.totalorder %s27_s20, 4   ;;  %s1434_s16 = smov %s991_s17 }
  0xe5   : > { %s1435_s17 = smov %s1101_s29  ;;  %s1436_s18 = smov %s999_s19 }
  0xe6   : > { %s1437_s19 = smov %s1439_s23  ;;  %26 = sbr.rel (!%p24_p0) target bundleno = 12 (0xc), region = 129 }
  0xed   :  { %555 = vsyncpa [#allocation6], 1 }
  0xee   :  { %557 = vsyncpa [#allocation6 + $0x1], 1 }
  0xef   :  { %558 = vsyncpa [#allocation9], 1 }
  0xf0   :  { %560 = vsyncpa [#allocation9 + $0x1], 1 }
  0xf1   :  { %561 = vsyncpa [#allocation7], 1 }
  0xf2   :  { %563 = vsyncpa [#allocation7 + $0x1], 1 }
  0xf3   :  { %564 = vsyncpa [#allocation12], 1 }
  0xf4   :  { %566 = vsyncpa [#allocation12 + $0x1], 1 }

</bundles_post_ra>
